<compile_context>
chip_gen: v7x
topology: tpu7x:2x2x1
jax: 0.10.0
libtpu: 0.0.40
codegen_flags: <defaults>
</compile_context>

<pallas_src>
import functools

import numpy as np
import jax
import jax.numpy as jnp
from jax.experimental import pallas as pl
from jax.experimental.pallas import tpu as pltpu


def _vit_embed_kernel(tokens_ref, w_ref, add_ref, out_ref):
    """One grid step: project Bt*Ts token rows and add the fused bias table.

    tokens_ref: (Bt, Ts, K) bf16   rows: [CLS zero row | patches | zero pad]
    w_ref:      (K, D)      bf16   conv weight as a projection matrix (resident)
    add_ref:    (Ts, D)     f32    pos_emb (+ cls for row 0, + conv bias else)
    out_ref:    (Bt, Ts, D) f32/bf16
    """
    bt, ts, k = tokens_ref.shape
    d = w_ref.shape[1]
    # Ts is padded to a multiple of 16 (bf16 sublane tile), so collapsing the
    # two leading dims is a free relabel; one big MXU matmul per grid step.
    tok = tokens_ref[...].reshape(bt * ts, k)
    proj = jnp.dot(tok, w_ref[...], preferred_element_type=jnp.float32)
    out = proj.reshape(bt, ts, d) + add_ref[...]        # (Ts,D) bcasts over Bt
    out_ref[...] = out.astype(out_ref.dtype)            # cast only at the store


def prepare_vit_embedding_params(conv_w, conv_b, cls_token, pos_emb):
    """Hoisted, per-parameter preprocessing (do once at param-load time).

    conv_w: (D, C, ph, pw) nn.Conv2d weight;  conv_b: (D,)
    cls_token: (1, 1, D);  pos_emb: (1, P+1, D)
    Returns:
      w_mat:   (K, D) bf16  projection matrix (K = C*ph*pw, Conv2d flattening)
      add_tab: (S, D) f32   add_tab[0] = cls + pos[0]; add_tab[1+p] = b + pos[1+p]
    """
    D, C, ph, pw = conv_w.shape
    K = C * ph * pw
    S = pos_emb.shape[1]
    w_mat = conv_w.reshape(D, K).T.astype(jnp.bfloat16)            # (K, D)
    pos = pos_emb.reshape(S, D).astype(jnp.float32)
    cls_row = cls_token.reshape(1, D).astype(jnp.float32) + pos[0:1]
    patch_rows = pos[1:] + conv_b.reshape(1, D).astype(jnp.float32)
    add_tab = jnp.concatenate([cls_row, patch_rows], axis=0)       # (S, D) f32
    return w_mat, add_tab


def _round_up(x, m):
    return (x + m - 1) // m * m


def _largest_divisor_leq(n, cap):
    for d in range(min(cap, n), 0, -1):
        if n % d == 0:
            return d
    return 1


def vit_embeddings_forward(pixel_values, w_mat, add_tab, *, patch_size,
                           out_dtype=jnp.float32):
    """pixel_values: (B, C, H, W) NCHW. Returns (B, P+1, D) in `out_dtype`."""
    B, C, H, W = pixel_values.shape
    ph = pw = patch_size
    Hp, Wp = H // ph, W // pw
    P = Hp * Wp
    S = P + 1
    K, D = w_mat.shape
    assert K == C * ph * pw and add_tab.shape == (S, D)

    # ---- tiling policy ---------------------------------------------------
    SUB = 16                                   # bf16 sublane tile (native pack)
    Sp0 = _round_up(S, SUB)
    ns = 1 if Sp0 <= 512 else pl.cdiv(Sp0, 256)          # seq tiles
    Bt = _largest_divisor_leq(B, 8)                      # images per grid step
    if (B // Bt) * ns < 2 and Sp0 >= 2 * SUB:
        ns = max(ns, 2)            # keep both v7x TensorCores busy for small B
    tile_s = _round_up(pl.cdiv(Sp0, ns), SUB)
    Sp = tile_s * ns

    out_bytes = np.dtype(out_dtype).itemsize
    def vmem_est(bt):              # conservative: double-buffer everything
        return 2 * (bt * tile_s * K * 2 + bt * tile_s * D * out_bytes
                    + K * D * 2 + tile_s * D * 4)
    while Bt > 1 and vmem_est(Bt) > 20 * 2**20:
        Bt = _largest_divisor_leq(B, Bt - 1)
    # <= 48 MiB: safe on v7x (64 MiB physical), above v5e's 16 MiB default.
    vmem_limit = int(min(max(32 * 2**20, 2 * vmem_est(Bt)), 48 * 2**20))

    # ---- patchify glue (single fused copy under jit) ----------------------
    # bf16 cast FIRST so the unavoidable patchify copy carries half the bytes;
    # (c, i, j) flattening matches nn.Conv2d, so the conv is exactly a matmul.
    x = pixel_values.astype(jnp.bfloat16)
    x = x.reshape(B, C, Hp, ph, Wp, pw)
    x = jnp.transpose(x, (0, 2, 4, 1, 3, 5))              # (B, Hp, Wp, C, ph, pw)
    patches = x.reshape(B, P, K)
    # ONE pad: CLS zero slot in front + sublane/tile padding at the back.
    tokens = jnp.pad(patches, ((0, 0), (1, Sp - S), (0, 0)))     # (B, Sp, K) bf16
    add_pad = jnp.pad(add_tab, ((0, Sp - S), (0, 0)))            # (Sp, D) f32

    grid = (B // Bt, ns)
    out = pl.pallas_call(
        _vit_embed_kernel,
        out_shape=jax.ShapeDtypeStruct((B, S, D), out_dtype),
        grid_spec=pltpu.PrefetchScalarGridSpec(
            num_scalar_prefetch=0,
            grid=grid,
            in_specs=[
                pl.BlockSpec((Bt, tile_s, K), lambda b, s: (b, s, 0)),
                pl.BlockSpec((K, D), lambda b, s: (0, 0)),        # VMEM-resident
                pl.BlockSpec((tile_s, D), lambda b, s: (s, 0)),
            ],
            # The last seq tile may extend past S; Pallas masks those stores.
            out_specs=pl.BlockSpec((Bt, tile_s, D), lambda b, s: (b, s, 0)),
        ),
        compiler_params=pltpu.CompilerParams(
            dimension_semantics=("parallel", "parallel"),
            vmem_limit_bytes=vmem_limit),
    )(tokens, w_mat, add_pad)
    return out


if __name__ == "__main__":
    # Small config consistent with the module:
    #   image_size=16, patch_size=4, num_channels=4, d_model=32
    #   -> num_patches = 16, seq_len = 17
    B, C, H, W = 2, 4, 16, 16
    patch_size = 4
    D = 32
    Hp, Wp = H // patch_size, W // patch_size
    P = Hp * Wp
    S = P + 1

    key = jax.random.PRNGKey(0)
    k1, k2, k3, k4, k5, k6 = jax.random.split(key, 6)
    pixel_values = jax.random.normal(k1, (B, C, H, W), dtype=jnp.float32)
    conv_w = jax.random.normal(k2, (D, C, patch_size, patch_size),
                               dtype=jnp.float32) * 0.02
    conv_b = jax.random.normal(k3, (D,), dtype=jnp.float32) * 0.02
    cls_token = jax.random.normal(k4, (1, 1, D), dtype=jnp.float32) * 0.02
    pos_emb = jax.random.normal(k5, (1, S, D), dtype=jnp.float32) * 0.02

    # Hoisted once (param-load time), not per forward.
    w_mat, add_tab = prepare_vit_embedding_params(conv_w, conv_b, cls_token,
                                                  pos_emb)
    fwd = jax.jit(functools.partial(vit_embeddings_forward,
                                    patch_size=patch_size))

    # Reference in plain JAX, using the same bf16-cast inputs as the kernel so
    # the check isolates kernel correctness (accumulation stays f32 everywhere).
    def reference(px):
        Bb = px.shape[0]
        xr = px.astype(jnp.bfloat16).astype(jnp.float32)
        xr = xr.reshape(Bb, C, Hp, patch_size, Wp, patch_size)
        xr = jnp.transpose(xr, (0, 2, 4, 1, 3, 5)).reshape(Bb, P, -1)
        wr = conv_w.reshape(D, -1).T.astype(jnp.bfloat16).astype(jnp.float32)
        proj = jnp.einsum("bpk,kd->bpd", xr, wr,
                          precision=jax.lax.Precision.HIGHEST)
        patch_rows = proj + conv_b[None, None, :] + pos_emb[:, 1:, :]
        cls_rows = jnp.broadcast_to(cls_token + pos_emb[:, 0:1, :], (Bb, 1, D))
        return jnp.concatenate([cls_rows, patch_rows], axis=1)

    # 1) Small batch (B=2): exercises the megacore seq split (2 seq tiles).
    out = jax.block_until_ready(fwd(pixel_values, w_mat, add_tab))
    ref = reference(pixel_values)
    assert out.shape == (B, S, D)
    assert jnp.allclose(out, ref, atol=1e-3, rtol=1e-3), \
        float(jnp.max(jnp.abs(out - ref)))

    # 2) Larger batch (B=16): exercises Bt=8 batching per grid step and the
    #    single seq tile (tile_s > S, masked tail store) path.
    B2 = 16
    pixel_values2 = jax.random.normal(k6, (B2, C, H, W), dtype=jnp.float32)
    out2 = jax.block_until_ready(fwd(pixel_values2, w_mat, add_tab))
    ref2 = reference(pixel_values2)
    assert out2.shape == (B2, S, D)
    assert jnp.allclose(out2, ref2, atol=1e-3, rtol=1e-3), \
        float(jnp.max(jnp.abs(out2 - ref2)))

    # 3) bf16 output path (halves the largest HBM stream; f32 accumulate kept).
    fwd_bf16 = jax.jit(functools.partial(vit_embeddings_forward,
                                         patch_size=patch_size,
                                         out_dtype=jnp.bfloat16))
    out3 = jax.block_until_ready(fwd_bf16(pixel_values, w_mat, add_tab))
    assert out3.dtype == jnp.bfloat16 and out3.shape == (B, S, D)
    assert jnp.allclose(out3.astype(jnp.float32), ref, atol=1e-2, rtol=2e-2), \
        float(jnp.max(jnp.abs(out3.astype(jnp.float32) - ref)))

    print("KERNEL_OK")
</pallas_src>

<mosaic_0001>
module attributes {stable_mosaic.version = 11 : i64} {
  func.func @_vit_embed_kernel(%arg0: i32, %arg1: i32, %arg2: memref<2x16x64xbf16, #tpu.memory_space<vmem>>, %arg3: memref<64x32xbf16, #tpu.memory_space<vmem>>, %arg4: memref<16x32xf32, #tpu.memory_space<vmem>>, %arg5: memref<2x16x32xf32, #tpu.memory_space<vmem>>) attributes {dimension_semantics = [#tpu.dimension_semantics<parallel>, #tpu.dimension_semantics<parallel>], iteration_bounds = array<i64: 1, 2>, scalar_prefetch = 0 : i64, scratch_operands = 0 : i64, tpu.core_type = #tpu.core_type<tc>, window_params = [{transform_indices = @transform_0, window_bounds = array<i64: 2, 16, 64>}, {pipeline_mode = #tpu.pipeline_mode<synchronous>, transform_indices = @transform_1, window_bounds = array<i64: 64, 32>}, {transform_indices = @transform_2, window_bounds = array<i64: 16, 32>}, {transform_indices = @transform_3, window_bounds = array<i64: 2, 16, 32>}]} {
    %c0 = arith.constant 0 : index
    %c0_0 = arith.constant 0 : index
    %c0_1 = arith.constant 0 : index
    %0 = vector.load %arg2[%c0, %c0_0, %c0_1] : memref<2x16x64xbf16, #tpu.memory_space<vmem>>, vector<2x16x64xbf16>
    %1 = vector.shape_cast %0 : vector<2x16x64xbf16> to vector<32x64xbf16>
    %c0_2 = arith.constant 0 : index
    %c0_3 = arith.constant 0 : index
    %2 = vector.load %arg3[%c0_2, %c0_3] : memref<64x32xbf16, #tpu.memory_space<vmem>>, vector<64x32xbf16>
    %cst = arith.constant dense<0.000000e+00> : vector<32x32xf32>
    %3 = tpu.matmul %1, %2, %cst {dimension_numbers = #tpu.dot_dimension_numbers<[1], [0], [0], [1], [0, 0, 1, 1], [], []>} : vector<32x64xbf16>, vector<64x32xbf16>, vector<32x32xf32> -> vector<32x32xf32>
    %4 = vector.shape_cast %3 : vector<32x32xf32> to vector<2x16x32xf32>
    %c0_4 = arith.constant 0 : index
    %c0_5 = arith.constant 0 : index
    %5 = vector.load %arg4[%c0_4, %c0_5] : memref<16x32xf32, #tpu.memory_space<vmem>>, vector<16x32xf32>
    %6 = vector.shape_cast %5 : vector<16x32xf32> to vector<1x16x32xf32>
    %7 = vector.broadcast %6 : vector<1x16x32xf32> to vector<2x16x32xf32>
    %8 = arith.addf %4, %7 : vector<2x16x32xf32>
    %c0_6 = arith.constant 0 : index
    %c0_7 = arith.constant 0 : index
    %c0_8 = arith.constant 0 : index
    %9 = vector.load %arg5[%c0_6, %c0_7, %c0_8] : memref<2x16x32xf32, #tpu.memory_space<vmem>>, vector<2x16x32xf32>
    tpu.vector_store %arg5[%c0_6, %c0_7, %c0_8], %8 {strides = array<i32>} : memref<2x16x32xf32, #tpu.memory_space<vmem>>, vector<2x16x32xf32>,
    return
  }
  func.func @transform_0(%arg0: i32, %arg1: i32) -> (i32, i32, i32) {
    %c0_i32 = arith.constant 0 : i32
    %c0_i32_0 = arith.constant 0 : i32
    return %arg0, %arg1, %c0_i32 : i32, i32, i32
  }
  func.func @transform_1(%arg0: i32, %arg1: i32) -> (i32, i32) {
    %c0_i32 = arith.constant 0 : i32
    %c0_i32_0 = arith.constant 0 : i32
    %c0_i32_1 = arith.constant 0 : i32
    return %c0_i32, %c0_i32_0 : i32, i32
  }
  func.func @transform_2(%arg0: i32, %arg1: i32) -> (i32, i32) {
    %c0_i32 = arith.constant 0 : i32
    %c0_i32_0 = arith.constant 0 : i32
    return %arg1, %c0_i32 : i32, i32
  }
  func.func @transform_3(%arg0: i32, %arg1: i32) -> (i32, i32, i32) {
    %c0_i32 = arith.constant 0 : i32
    %c0_i32_0 = arith.constant 0 : i32
    return %arg0, %arg1, %c0_i32 : i32, i32, i32
  }
}

</mosaic_0001>

<bundles_post_ra>
// kernel: vit_embeddings_forward.1
= control target key start
LH: loop header
LB: loop body
LE: loop exit
PB: predicated region body
PF: predicated region fallthrough
CT: control target
= control target key end

     0   :  { %s941_s12 = smov 0   ;;  %s943_s13 = smov 0   ;;  %s1078_s0 = inlined_call_operand.vmem [shape: bf16[2,32,64], index: 0, kind: input, shape index: {}]   ;;  %s1079_s1 = inlined_call_operand.vmem [shape: bf16[64,32], index: 1, kind: input, shape index: {}]   ;;  %s1080_s2 = inlined_call_operand.vmem [shape: f32[32,32], index: 2, kind: input, shape index: {}]   ;;  %s1081_s3 = inlined_call_operand.vmem [shape: f32[2,17,32], index: 3, kind: output, shape index: {}]  }
   0x1   :  { %s945_s14 = smov 0   ;;  %s947_s15 = smov 0  }
   0x2   :  { %s949_s16 = smov 0  }
   0x3 LB: > { %s22_s17 = sadd.s32 1, %s883_s15  ;;  %s648_s18 = sadd.s32 4294967295, %s887_s16   ;;  %s887_s16 = sphi %s949_s16, %s13_s16   ;;  %s883_s15 = sphi %s947_s15, %s1089_s15   ;;  %s879_s14 = sphi %s945_s14, %s1088_s14   ;;  %s875_s13 = sphi %s943_s13, %s1087_s13   ;;  %s871_s12 = sphi %s941_s12, %s1086_s12  }
   0x4   : > { %p23_p0 = scmp.ge.s32.totalorder %s22_s17, 2  ;;  %p41_p1 = scmp.ne.s32.totalorder %s875_s13, %s871_s12 }
   0x5   : > { %p42_p2 = scmp.eq.s32.totalorder %s887_s16, 0  ;;  %p120_p4 = scmp.eq.s32.totalorder %s648_s18, 1 }
   0x6   : > { %s1091_s17 = smov (%p23_p0, %s22_s17), 0  ;;  %s34_s20 = sadd.s32 1, %s875_s13 }
   0x7   : > { %p43_p3 = por %p42_p2, %p41_p1  ;;  %s30_s19 = ssub.s32 %s883_s15, %s1091_s17 }
   0x8   : > { %p32_p5 = scmp.eq.s32.totalorder %s30_s19, 0  ;;  %p976_p6 = por %p120_p4, %p41_p1 }
   0x9   : > { %p651_p7 = scmp.ge.s32.totalorder %s887_s16, 2 }
   0xa   : > { %s981_s22 = scalar_select %p32_p5, %s875_s13, %s34_s20  }
   0xb   : > { %145 = sbr.rel (%p651_p7) target bundleno = 25 (0x19), region = 20 }
  0x12   : > { %148 = sbr.rel (!%p43_p3) target bundleno = 25 (0x19), region = 24  ;;  %s150_s23 = sand.u32 (%p43_p3), 1, %s875_s13  }
  0x13   : > { %s685_s24 = sshll.u32 (%p43_p3), %s883_s15, 3  ;;  %s652_s25 = sshll.u32 (%p43_p3), %s150_s23, 4 }
  0x14   : > { %s158_s28 = scalar_lea.vmem (%p43_p3), %s1078_s0, %s685_s24  ;;  %s152_s29 = scalar_lea.vmem (%p43_p3), [#allocation2], %s652_s25 }
  0x15   : > { %v174_v0 = vld [vmem:[%s158_s28] sm:$0xff] (%p43_p3)   ;;  %v178_v1 = vld [vmem:[%s158_s28 + $0x10] sm:$0xff] (%p43_p3)  }
  0x16   : > { %175 = vst [vmem:[%s152_s29] sm:$0xff] (%p43_p3), %v174_v0   ;;  %179 = vst [vmem:[%s152_s29 + $0x8] sm:$0xff] (%p43_p3), %v178_v1  }
  0x19 PF: > { %p655_p8 = scmp.ge.s32.totalorder %s887_s16, 1  ;;  %p220_p9 = scmp.lt.s32.totalorder %s887_s16, 3 }
  0x1b   : > { %p221_p10 = pnand %p655_p8, %p220_p9 }
  0x1c   : > { %v811_v2 = vld [vmem:[%s1079_s1] sm:$0xff] (!%p221_p10)   ;;  %s227_s5 = sand.u32 (!%p221_p10), 1, %s871_s12   ;;  %v812_v3 = vld [vmem:[%s1079_s1 + $0x8] sm:$0xff] (!%p221_p10)   ;;  %v813_v4 = vld [vmem:[%s1079_s1 + $0x10] sm:$0xff] (!%p221_p10)   ;;  %vm315_vm0 = vcmask (!%p221_p10), 523264   ;;  %s658_s19 = sshll.u32 (!%p221_p10), %s879_s14, 1 }
  0x1d   : > { %224 = sbr.rel (%p221_p10) target bundleno = 312 (0x138), region = 69  ;;  %s656_s8 = sshll.u32 (!%p221_p10), %s227_s5, 4  ;;  %695 = vmatprep.subr.bf16.mxu0 (!%p221_p10), %v811_v2  ;;  %v814_v6 = vld [vmem:[%s1079_s1 + $0x18] sm:$0xff] (!%p221_p10)   ;;  %vm377_vm1 = vcmask (!%p221_p10), 261120  }
  0x1e   : > { %696 = vmatpush3.bf16.msra.mxu0 (!%p221_p10), %v811_v2  ;;  %s229_s11 = scalar_lea.vmem (!%p221_p10), [#allocation2], %s656_s8  ;;  %p257_p11 = scmp.lt.s32.totalorder (!%p221_p10), %s658_s19, 3 }
  0x1f   : > { %697 = vmatprep.subr.bf16.mxu0 (!%p221_p10), %v812_v3  ;;  %v815_v5 = vld [vmem:[%s229_s11] sm:$0xff] (!%p221_p10)   ;;  %v816_v7 = vld [vmem:[%s229_s11 + $0x8] sm:$0xff] (!%p221_p10)   ;;  %s657_s27 = sshll.u32 (!%p221_p10), %s227_s5, 5 }
  0x20   : > { %703 = vmatprep.mubr.msk.bf16.mxu0 (!%p221_p10), %vm315_vm0, %v815_v5  ;;  %s1008_s28 = scalar_lea.vmem (!%p221_p10), [#allocation3], %s657_s27  }
  0x22   : > { %698 = vmatpush3.bf16.msra.mxu0 (!%p221_p10), %v812_v3 }
  0x23   : > { %699 = vmatprep.subr.bf16.mxu0 (!%p221_p10), %v813_v4 }
  0x24   : > { %s258_s20 = scalar_select %p257_p11, %s658_s19, 3 }
  0x25   : > { %s391_s29 = ssub.s32 (%p976_p6), 3, %s658_s19  ;;  %s686_s30 = sshll.u32 (%p976_p6), %s879_s14, 4 }
  0x26   : > { %700 = vmatpush3.bf16.msra.mxu0 %v813_v4  ;;  %s659_s23 = sshll.u32 %s258_s20, 3  ;;  %p392_p12 = scmp.lt.s32.totalorder (%p976_p6), %s391_s29, 2 }
  0x27   : > { %701 = vmatprep.subr.bf16.mxu0 %v814_v6  ;;  %s260_s26 = scalar_lea.vmem %s1080_s2, %s659_s23  ;;  %s1020_s6 = scalar_lea.vmem (%p976_p6), %s1081_s3, %s686_s30  }
  0x28   : > { %v371_v8 = vld [vmem:[%s260_s26] sm:$0xff]  ;;  %v372_v10 = vld [vmem:[%s260_s26 + $0x8] sm:$0xff] }
  0x2a   : > { %702 = vmatpush3.bf16.msra.mxu0 %v814_v6 }
  0x2d   : > { %704 = vmatmul.mubr.msk.bf16.vlgmr.msra.gmra.mrb[0].mxu0 %vm315_vm0, %v816_v7 }
 0x100   : > { %v705_v9 = vpop.f32.mrb[0].mxu0  ;;  %388 = sbr.rel (!%p976_p6) target bundleno = 312 (0x138), region = 77 }
 0x101   : > { %v375_v11 = vadd.f32 %v705_v9, %v371_v8  ;;  %v356_v12 = vpop.f32.mrb[1].mxu0 }
 0x102   : > { %v373_v13 = vadd.f32 %v371_v8, %v356_v12  ;;  %v706_v14 = vpop.f32.mrb[2].mxu0 }
 0x103   : > { %380 = vst.msk [vmem:[%s1008_s28 + $0x10] sm:$0xff] %vm377_vm1, %v375_v11  ;;  %v376_v15 = vadd.f32 %v706_v14, %v372_v10  ;;  %v359_v16 = vpop.f32.mrb[3].mxu0 }
 0x104   : > { %378 = vst.msk [vmem:[%s1008_s28] sm:$0xff] %vm377_vm1, %v373_v13  ;;  %v374_v17 = vadd.f32 %v372_v10, %v359_v16 }
 0x105   : > { %381 = vst.msk [vmem:[%s1008_s28 + $0x18] sm:$0xff] %vm377_vm1, %v376_v15 }
 0x106   : > { %379 = vst.msk [vmem:[%s1008_s28 + $0x8] sm:$0xff] %vm377_vm1, %v374_v17 }
 0x107   : > { %s1093_s29 = smov (!%p392_p12, %s391_s29), 2 }
 0x108   : > { %s670_s7 = sshll.u32 %s1093_s29, 8 }
 0x109   : > { %p673_p13 = scmp.eq.s32.totalorder %s670_s7, 0 }
 0x10a   : > { %s1026_s8 = sshrl.u32 (!%p673_p13), %s1093_s29, 1 }
 0x10b   : > { %402 = sbr.rel (%p673_p13) target bundleno = 312 (0x138), region = 81  ;;  %p674_p0 = scmp.le.s32.totalorder (!%p673_p13), %s1026_s8, 0 }
 0x112   : > { %590 = sbr.rel (%p674_p0) target bundleno = 291 (0x123), region = 165  ;;  %s1083_s14 = smov (!%p674_p0), %s1020_s6 }
 0x113   : > { %s1084_s21 = smov (!%p674_p0), %s1008_s28  ;;  %s1035_s9 = smov (!%p674_p0), 0  }
 0x114   : > { %s901_s10 = smov (!%p674_p0), 0  }
 0x119 LB: >> { %v472_v18 = vld [vmem:[%s895_s21] sm:$0xff]  ;;  %v474_v19 = vld [vmem:[%s895_s21 + $0x8] sm:$0xff]  ;;  %v476_v20 = vld [vmem:[%s895_s21 + $0x10] sm:$0xff]  ;;  %s480_s11 = sadd.s32 1, %s899_s9  ;;  %s466_s10 = sadd.s32 1, %s903_s10   ;;  %s903_s10 = sphi %s901_s10, %s466_s10   ;;  %s899_s9 = sphi %s1035_s9, %s1085_s9   ;;  %s895_s21 = sphi %s1084_s21, %s485_s21   ;;  %s891_s14 = sphi %s1083_s14, %s486_s14  }
 0x11a   : >> { %473 = vst [vmem:[%s891_s14] sm:$0xff] %v472_v18  ;;  %475 = vst [vmem:[%s891_s14 + $0x8] sm:$0xff] %v474_v19  ;;  %v478_v21 = vld [vmem:[%s895_s21 + $0x18] sm:$0xff]  ;;  %p481_p1 = scmp.ge.s32.totalorder %s480_s11, %s1026_s8  ;;  %p465_p2 = scmp.ge.s32.totalorder %s466_s10, %s1026_s8 }
 0x11b   : >> { %477 = vst [vmem:[%s891_s14 + $0x18] sm:$0xff] %v476_v20  ;;  %479 = vst [vmem:[%s891_s14 + $0x20] sm:$0xff] %v478_v21 }
 0x11c   : >> { %s1095_s11 = smov (%p481_p1, %s480_s11), 0  ;;  %468 = sbr.rel (!%p465_p2) target bundleno = 281 (0x119), region = 171 }
 0x11d   : >> { %s675_s12 = sshll.u32 %s1095_s11, 4  ;;  %s1085_s9 = smov %s1095_s11 }
 0x11e   : >> { %s485_s21 = scalar_lea.vmem %s1008_s28, %s675_s12 [#allocation3]   ;;  %s486_s14 = scalar_lea.vmem %s1020_s6, %s675_s12  }
 0x123 PF: > { %s1051_s18 = sand.u32 1, %s1093_s29   ;;  %s687_s19 = sshll.u32 %s1026_s8, 4 }
 0x124   : > { %s1055_s20 = scalar_lea.vmem %s1008_s28, %s687_s19 [#allocation3]   ;;  %s493_s23 = scalar_lea.vmem %s1020_s6, %s687_s19  }
 0x125   : > { %p680_p3 = scmp.le.s32.totalorder %s1051_s18, 0 }
 0x126   : > { %s905_s24 = smov (!%p680_p3), %s493_s23   ;;  %s909_s25 = smov (!%p680_p3), %s1055_s20  }
 0x127   : > { %604 = sbr.rel (%p680_p3) target bundleno = 312 (0x138), region = 176  ;;  %s913_s26 = smov (!%p680_p3), 0  }
 0x128   : > { %s917_s27 = smov (!%p680_p3), 0  }
 0x12e LB: >> { %v503_v22 = vld [vmem:[%s911_s25] sm:$0xff]  ;;  %v505_v23 = vld [vmem:[%s911_s25 + $0x10] sm:$0xff]  ;;  %s507_s28 = sadd.s32 1, %s915_s26  ;;  %s497_s27 = sadd.s32 1, %s919_s27   ;;  %s919_s27 = sphi %s917_s27, %s497_s27   ;;  %s915_s26 = sphi %s913_s26, %s914_s26   ;;  %s911_s25 = sphi %s909_s25, %s512_s25   ;;  %s907_s24 = sphi %s905_s24, %s513_s24  }
 0x12f   : >> { %504 = vst [vmem:[%s907_s24] sm:$0xff] %v503_v22  ;;  %506 = vst [vmem:[%s907_s24 + $0x18] sm:$0xff] %v505_v23  ;;  %p508_p4 = scmp.ge.s32.totalorder %s507_s28, %s1051_s18  ;;  %p496_p5 = scmp.ge.s32.totalorder %s497_s27, %s1051_s18 }
 0x131   : >> { %s1097_s28 = smov (%p508_p4, %s507_s28), 0  ;;  %499 = sbr.rel (!%p496_p5) target bundleno = 302 (0x12e), region = 182 }
 0x132   : >> { %s681_s29 = sshll.u32 %s1097_s28, 3  ;;  %s914_s26 = smov %s1097_s28  }
 0x133   : >> { %s512_s25 = scalar_lea.vmem %s1055_s20, %s681_s29 [#allocation3]   ;;  %s513_s24 = scalar_lea.vmem %s493_s23, %s681_s29  }
 0x138 PF: > { %s13_s16 = sadd.s32 1, %s887_s16   ;;  %s1086_s12 = smov %s875_s13 }
 0x139   : > { %p10_p6 = scmp.ge.s32.totalorder %s13_s16, 4   ;;  %s1087_s13 = smov %s981_s22 }
 0x13a   : > { %s1088_s14 = smov %s883_s15  ;;  %s1089_s15 = smov %s1091_s17 }
 0x13b   :  { %12 = sbr.rel (!%p10_p6) target bundleno = 3 (0x3), region = 193 }

</bundles_post_ra>
